<compile_context>
chip_gen: v7x
topology: tpu7x:2x2x1
jax: 0.10.0
libtpu: 0.0.40
codegen_flags: <defaults>
</compile_context>

<pallas_src>
import jax
import jax.numpy as jnp
from jax import lax
from jax.experimental import pallas as pl
from jax.experimental.pallas import tpu as pltpu


def _round_up(n, m):
    return ((n + m - 1) // m) * m


def _proj_kernel(x_ref, w_ref, b_ref, o_ref):
    # x_ref: (F, tt)   w_ref: (F, E_pad)   b_ref: (1, E_pad)   o_ref: (tt, E_pad)
    # Contract F on both operands: (F, tt) x (F, E) -> (tt, E).  MXU, f32 accumulate.
    acc = lax.dot_general(
        x_ref[...], w_ref[...],
        dimension_numbers=(((0,), (0,)), ((), ())),
        preferred_element_type=jnp.float32,
    )
    o_ref[...] = (acc + b_ref[...]).astype(o_ref.dtype)   # f32 epilogue, lane-dense store


def patch_frequency_embedding(x, weight, bias, *, tm=512, compute_dtype=None):
    """
    x:      (batch, freq, time)   float32  (native layout; no pre-transpose)
    weight: (emb_size, n_freq)    float32  (torch nn.Linear convention)
    bias:   (emb_size,)           float32
    returns (batch, time, emb_size)

    compute_dtype: optional (e.g. jnp.bfloat16) cast of x / W at the kernel boundary
    to halve input HBM traffic; accumulation stays f32.  Default None keeps exact
    f32 module numerics.
    """
    B, F, T = x.shape
    E, F_w = weight.shape
    assert F == F_w, "freq dim mismatch"
    assert tm >= 128

    E_pad = _round_up(E, 128)   # lane-dense output dim (no-op for the default E=256)

    # One-time weight prep: (E, F) -> (F, E); pad E only if not 128-aligned.
    w_fe = weight.T
    b2 = bias.reshape(1, E)
    if E_pad != E:
        w_fe = jnp.pad(w_fe, ((0, 0), (0, E_pad - E)))
        b2 = jnp.pad(b2, ((0, 0), (0, E_pad - E)))

    x_in = x
    if compute_dtype is not None:        # opt-in bf16 inputs (documented deviation)
        x_in = x.astype(compute_dtype)
        w_fe = w_fe.astype(compute_dtype)

    # Time tiling: full extent when T fits in one tile (always a legal block shape),
    # else a multiple of 128 <= tm; the last partial tile is handled by Pallas.
    tt = T if T <= tm else (tm // 128) * 128
    grid = (B, pl.cdiv(T, tt))

    out = pl.pallas_call(
        _proj_kernel,
        out_shape=jax.ShapeDtypeStruct((B, T, E_pad), x.dtype),
        grid_spec=pltpu.PrefetchScalarGridSpec(
            num_scalar_prefetch=0,
            grid=grid,
            in_specs=[
                # x in native (B, F, T) layout; batch dim squeezed out of the kernel ref.
                pl.BlockSpec((None, F, tt), lambda b, t: (b, 0, t)),
                pl.BlockSpec((F, E_pad), lambda b, t: (0, 0)),   # weight (VMEM-resident)
                pl.BlockSpec((1, E_pad), lambda b, t: (0, 0)),   # bias   (VMEM-resident)
            ],
            out_specs=pl.BlockSpec((None, tt, E_pad), lambda b, t: (b, t, 0)),
        ),
        compiler_params=pltpu.CompilerParams(
            dimension_semantics=("parallel", "parallel"),   # shard over both TCs on v7x
            vmem_limit_bytes=32 * 1024 * 1024,              # safe on v5e/v6e/v7x
        ),
    )(x_in, w_fe, b2)

    if E_pad != E:
        # Only hit for non-128-multiple emb sizes; prefer slicing lazily at the
        # consumer to avoid an extra full output pass.  Moot for the default E=256.
        out = out[:, :, :E]
    return out


def init_params(key, emb_size, n_freq, encoder_var=1.0):
    """Matches the module init: W ~ N(0, encoder_var/n_freq), b = 0."""
    sigma = (encoder_var / n_freq) ** 0.5
    w = sigma * jax.random.normal(key, (emb_size, n_freq), dtype=jnp.float32)
    b = jnp.zeros((emb_size,), dtype=jnp.float32)
    return w, b


if __name__ == "__main__":
    key = jax.random.PRNGKey(0)
    k_x, k_w = jax.random.split(key)

    # Small shapes consistent with the module (n_freq = n_fft//2+1 = 101,
    # emb_size = module default 256, a few STFT time frames).
    batch, n_freq, time_len, emb_size = 2, 101, 8, 256
    x = jax.random.normal(k_x, (batch, n_freq, time_len), dtype=jnp.float32)
    weight, bias = init_params(k_w, emb_size, n_freq, encoder_var=1.0)

    out = jax.block_until_ready(patch_frequency_embedding(x, weight, bias))

    # Reference check in plain JAX.
    ref = jnp.einsum("bft,ef->bte", x, weight) + bias[None, None, :]
    assert out.shape == (batch, time_len, emb_size)
    assert jnp.allclose(out, ref, atol=1e-4, rtol=1e-4)

    print("KERNEL_OK")
</pallas_src>

<mosaic_0001>
module attributes {stable_mosaic.version = 11 : i64} {
  func.func @_proj_kernel(%arg0: i32, %arg1: i32, %arg2: memref<1x101x8xf32, #tpu.memory_space<vmem>>, %arg3: memref<101x256xf32, #tpu.memory_space<vmem>>, %arg4: memref<1x256xf32, #tpu.memory_space<vmem>>, %arg5: memref<1x8x256xf32, #tpu.memory_space<vmem>>) attributes {dimension_semantics = [#tpu.dimension_semantics<parallel>, #tpu.dimension_semantics<parallel>], iteration_bounds = array<i64: 2, 1>, scalar_prefetch = 0 : i64, scratch_operands = 0 : i64, tpu.core_type = #tpu.core_type<tc>, window_params = [{transform_indices = @transform_0, window_bounds = array<i64: 1, 101, 8>}, {pipeline_mode = #tpu.pipeline_mode<synchronous>, transform_indices = @transform_1, window_bounds = array<i64: 101, 256>}, {pipeline_mode = #tpu.pipeline_mode<synchronous>, transform_indices = @transform_2, window_bounds = array<i64: 1, 256>}, {transform_indices = @transform_3, window_bounds = array<i64: 1, 8, 256>}]} {
    %c0 = arith.constant 0 : index
    %c0_0 = arith.constant 0 : index
    %c0_1 = arith.constant 0 : index
    %0 = vector.load %arg2[%c0, %c0_0, %c0_1] : memref<1x101x8xf32, #tpu.memory_space<vmem>>, vector<1x101x8xf32>
    %1 = vector.shape_cast %0 : vector<1x101x8xf32> to vector<101x8xf32>
    %c0_2 = arith.constant 0 : index
    %c0_3 = arith.constant 0 : index
    %2 = vector.load %arg3[%c0_2, %c0_3] : memref<101x256xf32, #tpu.memory_space<vmem>>, vector<101x256xf32>
    %cst = arith.constant dense<0.000000e+00> : vector<8x256xf32>
    %3 = tpu.matmul %1, %2, %cst {dimension_numbers = #tpu.dot_dimension_numbers<[0], [0], [1], [1], [0, 1, 1, 1], [], []>} : vector<101x8xf32>, vector<101x256xf32>, vector<8x256xf32> -> vector<8x256xf32>
    %c0_4 = arith.constant 0 : index
    %c0_5 = arith.constant 0 : index
    %4 = vector.load %arg4[%c0_4, %c0_5] : memref<1x256xf32, #tpu.memory_space<vmem>>, vector<1x256xf32>
    %5 = vector.broadcast %4 : vector<1x256xf32> to vector<8x256xf32>
    %6 = arith.addf %3, %5 : vector<8x256xf32>
    %c0_6 = arith.constant 0 : index
    %c0_7 = arith.constant 0 : index
    %c0_8 = arith.constant 0 : index
    %7 = vector.load %arg5[%c0_6, %c0_7, %c0_8] : memref<1x8x256xf32, #tpu.memory_space<vmem>>, vector<1x8x256xf32>
    %8 = vector.shape_cast %7 : vector<1x8x256xf32> to vector<8x256xf32>
    %9 = vector.shape_cast %6 : vector<8x256xf32> to vector<1x8x256xf32>
    tpu.vector_store %arg5[%c0_6, %c0_7, %c0_8], %9 {strides = array<i32>} : memref<1x8x256xf32, #tpu.memory_space<vmem>>, vector<1x8x256xf32>,
    return
  }
  func.func @transform_0(%arg0: i32, %arg1: i32) -> (i32, i32, i32) {
    %c0_i32 = arith.constant 0 : i32
    %c0_i32_0 = arith.constant 0 : i32
    return %arg0, %c0_i32, %arg1 : i32, i32, i32
  }
  func.func @transform_1(%arg0: i32, %arg1: i32) -> (i32, i32) {
    %c0_i32 = arith.constant 0 : i32
    %c0_i32_0 = arith.constant 0 : i32
    %c0_i32_1 = arith.constant 0 : i32
    return %c0_i32, %c0_i32_0 : i32, i32
  }
  func.func @transform_2(%arg0: i32, %arg1: i32) -> (i32, i32) {
    %c0_i32 = arith.constant 0 : i32
    %c0_i32_0 = arith.constant 0 : i32
    %c0_i32_1 = arith.constant 0 : i32
    return %c0_i32, %c0_i32_0 : i32, i32
  }
  func.func @transform_3(%arg0: i32, %arg1: i32) -> (i32, i32, i32) {
    %c0_i32 = arith.constant 0 : i32
    %c0_i32_0 = arith.constant 0 : i32
    return %arg0, %arg1, %c0_i32 : i32, i32, i32
  }
}

</mosaic_0001>

<bundles_post_ra>
// kernel: tpu_custom_call.1
= control target key start
LH: loop header
LB: loop body
LE: loop exit
PB: predicated region body
PF: predicated region fallthrough
CT: control target
= control target key end

     0   :  { %8 = vsyncpa [#allocation3], 0  ;;  %s861_s0 = inlined_call_operand.vmem [shape: f32[2,101,8], index: 0, kind: input, shape index: {}]   ;;  %s862_s1 = inlined_call_operand.vmem [shape: f32[101,256], index: 1, kind: input, shape index: {}]   ;;  %s863_s2 = inlined_call_operand.vmem [shape: f32[1,256], index: 2, kind: input, shape index: {}]   ;;  %s864_s3 = inlined_call_operand.hbm [shape: f32[2,8,256], index: 3, kind: output, shape index: {}]  }
   0x1   :  { %10 = vsyncpa [#allocation3 + $0x1], 0  ;;  %s653_s12 = smov 0   ;;  %s655_s13 = smov 0  }
   0x2   :  { %s657_s14 = smov 0   ;;  %s659_s15 = smov 0  }
   0x3   :  { %s661_s16 = smov 0   ;;  %s663_s17 = smov 0  }
   0x4 LB: > { %s454_s18 = sadd.s32 4294967295, %s629_s17   ;;  %s455_s19 = sadd.s32 4294967294, %s629_s17   ;;  %s629_s17 = sphi %s663_s17, %s16_s17   ;;  %s625_s16 = sphi %s661_s16, %s871_s16   ;;  %s621_s15 = sphi %s659_s15, %s870_s15   ;;  %s617_s14 = sphi %s657_s14, %s869_s14   ;;  %s613_s13 = sphi %s655_s13, %s868_s13   ;;  %s609_s12 = sphi %s653_s12, %s867_s12  }
   0x5   : > { %s28_s20 = sadd.s32 1, %s625_s16  ;;  %s107_s21 = sadd.s32 1, %s617_s14 }
   0x6   : > { %p30_p0 = scmp.ge.s32.totalorder %s28_s20, 2  ;;  %p117_p1 = scmp.ne.s32.totalorder %s617_s14, %s613_s13 }
   0x7   : > { %p118_p2 = scmp.eq.s32.totalorder %s454_s18, 1  ;;  %p123_p3 = scmp.ne.s32.totalorder %s613_s13, %s609_s12 }
   0x8   : > { %s873_s20 = smov (%p30_p0, %s28_s20), 0  ;;  %p124_p5 = scmp.eq.s32.totalorder %s455_s19, 1 }
   0x9   : > { %p693_p4 = por %p118_p2, %p117_p1  ;;  %s102_s23 = ssub.s32 %s625_s16, %s873_s20 }
   0xa   : > { %p458_p6 = scmp.ge.s32.totalorder %s629_s17, 1  ;;  %p105_p7 = scmp.eq.s32.totalorder %s102_s23, 0 }
   0xb   : > { %p700_p8 = por %p124_p5, %p123_p3  ;;  %p159_p9 = scmp.lt.s32.totalorder %s629_s17, 3 }
   0xc   : > { %s706_s25 = scalar_select %p105_p7, %s617_s14, %s107_s21  }
   0xd   : > { %p160_p10 = pnand %p458_p6, %p159_p9 }
   0xe   : > { %p186_p11 = scmp.lt.s32.totalorder (!%p160_p10), %s621_s15, 1  ;;  %v208_v0 = vld [vmem:[%s862_s1 + $0x8] sm:$0xff] (!%p160_p10)  ;;  %v210_v1 = vld [vmem:[%s862_s1 + $0x18] sm:$0xff] (!%p160_p10)  ;;  %v207_v2 = vld [vmem:[%s862_s1] sm:$0xff] (!%p160_p10)  ;;  %v631_v7 = vmov (!%p160_p10), 0.0   ;;  %vm281_vm0 = vcmask (!%p160_p10), 1044480   ;;  %v235_v53 = vlaneseq (!%p160_p10) }
   0xf   : > { %163 = sbr.rel (%p160_p10) target bundleno = 386 (0x182), region = 32  ;;  %v470_v3 = vpack.c.bf16 (!%p160_p10), %v210_v1, %v208_v0  ;;  %v209_v4 = vld [vmem:[%s862_s1 + $0x10] sm:$0xff] (!%p160_p10)  ;;  %v212_v5 = vld [vmem:[%s862_s1 + $0x28] sm:$0xff] (!%p160_p10)  ;;  %v214_v6 = vld [vmem:[%s862_s1 + $0x38] sm:$0xff] (!%p160_p10)  ;;  %352 = vmatprep.mubr.f32.mxu0 (!%p160_p10), %v631_v7  ;;  %vm277_vm1 = vcmask (!%p160_p10), 826368   ;;  %s183_s6 = sand.u32 (!%p160_p10), 1, %s613_s13  }
  0x10   : > { %v472_v8 = vpack.c.bf16 (!%p160_p10), %v209_v4, %v207_v2  ;;  %v474_v9 = vpack.c.bf16 (!%p160_p10), %v214_v6, %v212_v5  ;;  %v211_v10 = vld [vmem:[%s862_s1 + $0x20] sm:$0xff] (!%p160_p10)  ;;  %v213_v11 = vld [vmem:[%s862_s1 + $0x30] sm:$0xff] (!%p160_p10)  ;;  %v216_v12 = vld [vmem:[%s862_s1 + $0x48] sm:$0xff] (!%p160_p10)  ;;  %v236_v54 = vshrl.u32 (!%p160_p10), %v235_v53, 7  ;;  %s459_s7 = sshll.u32 (!%p160_p10), %s183_s6, 4  ;;  %s469_s18 = sshll.u32 (!%p160_p10), %s621_s15, 8 }
  0x11   : > { %471 = vmatprep.subr.bf16.mxu0 (!%p160_p10), %v470_v3  ;;  %v218_v13 = vld [vmem:[%s862_s1 + $0x58] sm:$0xff] (!%p160_p10)  ;;  %v476_v14 = vpack.c.bf16 (!%p160_p10), %v213_v11, %v211_v10  ;;  %v215_v16 = vld [vmem:[%s862_s1 + $0x40] sm:$0xff] (!%p160_p10)  ;;  %v217_v17 = vld [vmem:[%s862_s1 + $0x50] sm:$0xff] (!%p160_p10)  ;;  %s185_s19 = scalar_lea.vmem (!%p160_p10), [#allocation2], %s459_s7  ;;  %s814_s23 = scalar_lea.hbm (!%p160_p10), %s864_s3, %s469_s18 }
  0x12   : > { %473 = vmatpush1.bf16.msra.mxu0 (!%p160_p10), %v472_v8  ;;  %v478_v15 = vpack.c.bf16 (!%p160_p10), %v218_v13, %v216_v12  ;;  %v220_v18 = vld [vmem:[%s862_s1 + $0x68] sm:$0xff] (!%p160_p10)  ;;  %v222_v19 = vld [vmem:[%s862_s1 + $0x78] sm:$0xff] (!%p160_p10)  ;;  %v480_v21 = vpack.c.bf16 (!%p160_p10), %v217_v17, %v215_v16  ;;  %v219_v24 = vld [vmem:[%s862_s1 + $0x60] sm:$0xff] (!%p160_p10)  ;;  %v237_v55 = vsub.s32 (!%p160_p10), 0, %v236_v54  ;;  %v241_v57 = vsub.s32 (!%p160_p10), 1, %v236_v54  ;;  %s362_s26 = scalar_lea.sflag (!%p160_p10), [#allocation3], %s183_s6 }
  0x13   : > { %475 = vmatprep.subr.bf16.mxu0 (!%p160_p10), %v474_v9  ;;  %v482_v23 = vpack.c.bf16 (!%p160_p10), %v222_v19, %v220_v18  ;;  %v221_v25 = vld [vmem:[%s862_s1 + $0x70] sm:$0xff] (!%p160_p10)  ;;  %v224_v26 = vld [vmem:[%s862_s1 + $0x88] sm:$0xff] (!%p160_p10)  ;;  %v226_v27 = vld [vmem:[%s862_s1 + $0x98] sm:$0xff] (!%p160_p10)  ;;  %s632_s27 = smov (!%p160_p10), [#allocation2]  }
  0x14   : > { %v484_v28 = vpack.c.bf16 (!%p160_p10), %v221_v25, %v219_v24  ;;  %v486_v30 = vpack.c.bf16 (!%p160_p10), %v226_v27, %v224_v26  ;;  %v223_v31 = vld [vmem:[%s862_s1 + $0x80] sm:$0xff] (!%p160_p10)  ;;  %v225_v32 = vld [vmem:[%s862_s1 + $0x90] sm:$0xff] (!%p160_p10)  ;;  %v228_v33 = vld [vmem:[%s862_s1 + $0xa8] sm:$0xff] (!%p160_p10)  ;;  %s555_s28 = sshll.u32 (!%p160_p10), %s632_s27, 4  ;;  %s556_s28 = int_to_ptr.vmem [resolvable:$false] %s555_s28 }
  0x15   : > { %v230_v34 = vld [vmem:[%s862_s1 + $0xb8] sm:$0xff] (!%p160_p10)  ;;  %v488_v35 = vpack.c.bf16 (!%p160_p10), %v225_v32, %v223_v31  ;;  %v227_v38 = vld [vmem:[%s862_s1 + $0xa0] sm:$0xff] (!%p160_p10)  ;;  %v229_v39 = vld [vmem:[%s862_s1 + $0xb0] sm:$0xff] (!%p160_p10)  ;;  %s557_s29 = scalar_lea.vmem (!%p160_p10), %s556_s28, 512 }
  0x16   : > { %s187_s11 = scalar_select %p186_p11, %s621_s15, 1  ;;  %477 = vmatpush1.bf16.msra.mxu0 %v476_v14  ;;  %v490_v37 = vpack.c.bf16 %v230_v34, %v228_v33  ;;  %v492_v40 = vpack.c.bf16 %v229_v39, %v227_v38  ;;  %v232_v42 = vld [vmem:[%s862_s1 + $0xc8] sm:$0x1f]  ;;  %v231_v44 = vld [vmem:[%s862_s1 + $0xc0] sm:$0x1f] }
  0x17   : > { %479 = vmatprep.subr.bf16.mxu0 %v478_v15  ;;  %v233_v56 = vld [vmem:[%s863_s2] sm:$0x3] }
  0x18   : > { %s494_s30 = smul.u32 104, %s187_s11  ;;  %v238_v58 = vrot.slane %v233_v56, %v237_v55  ;;  %v242_v59 = vrot.slane %v233_v56, %v241_v57 }
  0x1a   : > { %s749_s10 = scalar_lea.vmem %s861_s0, %s494_s30  ;;  %481 = vmatpush1.bf16.msra.mxu0 %v480_v21 }
  0x1b   : > { %v194_v20 = vld [vmem:[%s749_s10] sm:$0xff]  ;;  %v195_v22 = vld [vmem:[%s749_s10 + $0x8] sm:$0xff]  ;;  %v196_v29 = vld [vmem:[%s749_s10 + $0x10] sm:$0xff]  ;;  %483 = vmatprep.subr.bf16.mxu0 %v482_v23 }
  0x1c   : > { %245 = vxpose.xlu0.b32.start [1/13] (short) (narrow) %v194_v20, 8  ;;  %v197_v36 = vld [vmem:[%s749_s10 + $0x18] sm:$0xff]  ;;  %v198_v41 = vld [vmem:[%s749_s10 + $0x20] sm:$0xff]  ;;  %v199_v43 = vld [vmem:[%s749_s10 + $0x28] sm:$0xff] }
  0x1d   : > { %v200_v45 = vld [vmem:[%s749_s10 + $0x30] sm:$0xff]  ;;  %v201_v46 = vld [vmem:[%s749_s10 + $0x38] sm:$0xff]  ;;  %v202_v47 = vld [vmem:[%s749_s10 + $0x40] sm:$0xff] }
  0x1e   : > { %485 = vmatpush1.bf16.msra.mxu0 %v484_v28  ;;  %v203_v48 = vld [vmem:[%s749_s10 + $0x48] sm:$0xff]  ;;  %v204_v49 = vld [vmem:[%s749_s10 + $0x50] sm:$0xff]  ;;  %v205_v50 = vld [vmem:[%s749_s10 + $0x58] sm:$0xff] }
  0x1f   : > { %487 = vmatprep.subr.bf16.mxu0 %v486_v30  ;;  %v206_v51 = vld [vmem:[%s749_s10 + $0x60] sm:$0x1f]  ;;  %s378_s10 = sshll.u32 %s185_s19, 4  ;;  %s816_s10 = int_to_ptr.vmem [resolvable:$true] %s378_s10 }
  0x20   : > { %246 = vxpose.xlu0.b32.cont [2/13] (short) (narrow) %v195_v22, 8  ;;  %s551_s15 = scalar_lea.vmem %s816_s10, 256  ;;  %p558_p1 = scmp.lt.s32.totalorder %s816_s10, %s556_s28 }
  0x21   : > { %p552_p12 = scmp.ne.s32.totalorder %s816_s10, %s551_s15  ;;  %p559_p2 = scmp.lt.s32.totalorder %s557_s29, %s551_s15 }
  0x22   : > { %489 = vmatpush1.bf16.msra.mxu0 %v488_v35 }
  0x23   : > { %491 = vmatprep.subr.bf16.mxu0 %v490_v37  ;;  %p553_p13 = pnand %p552_p12, %p693_p4  ;;  %p560_p3 = por %p559_p2, %p558_p1 }
  0x24   : > { %247 = vxpose.xlu0.b32.cont [3/13] (short) (narrow) %v196_v29, 8 }
  0x25   : > { %p554_p0 = pneg %p553_p13 }
  0x26   : > { %493 = vmatpush1.bf16.msra.mxu0 %v492_v40 }
  0x27   : > { %461 = vmatprep.subr.msk.mxu0 %vm281_vm0, %v232_v42  ;;  %p561_p5 = pnand %p560_p3, %p554_p0 }
  0x28   : > { %248 = vxpose.xlu0.b32.cont [4/13] (short) (narrow) %v197_v36, 8 }
  0x2a   : > { %462 = vmatpush1.msk.msra.mxu0 %vm281_vm0, %v231_v44 }
  0x2c   : > { %249 = vxpose.xlu0.b32.cont [5/13] (short) (narrow) %v198_v41, 8 }
  0x30   : > { %250 = vxpose.xlu0.b32.cont [6/13] (short) (narrow) %v199_v43, 8 }
  0x34   : > { %251 = vxpose.xlu0.b32.cont [7/13] (short) (narrow) %v200_v45, 8 }
  0x38   : > { %252 = vxpose.xlu0.b32.cont [8/13] (short) (narrow) %v201_v46, 8 }
  0x3c   : > { %253 = vxpose.xlu0.b32.cont [9/13] (short) (narrow) %v202_v47, 8 }
  0x40   : > { %254 = vxpose.xlu0.b32.cont [10/13] (short) (narrow) %v203_v48, 8 }
  0x44   : > { %255 = vxpose.xlu0.b32.cont [11/13] (short) (narrow) %v204_v49, 8 }
  0x48   : > { %256 = vxpose.xlu0.b32.cont [12/13] (short) (narrow) %v205_v50, 8 }
  0x4c   : > { %257 = vxpose.xlu0.b32.end [13/13] (short) (narrow) %v206_v51, 8 }
  0x9c   : > { %v261_v52 = vpop.trf.xlu0 }
  0x9d   : > { %463 = vmatmul.mubr.msk.f32.vlgmr.msra.gmra.mrb[0].mxu0 %vm277_vm1, %v261_v52 }
 0x170   : > { %v354_v60 = vpop.f32.mrb[0].mxu0 }
 0x171   : > { %v355_v61 = vadd.f32 %v354_v60, %v238_v58  ;;  %v356_v62 = vpop.f32.mrb[1].mxu0 }
 0x172   : > { %v357_v63 = vadd.f32 %v356_v62, %v242_v59 }
 0x173   : > { %359 = vst [vmem:[%s185_s19] sm:$0xff] %v355_v61 }
 0x174   : > { %360 = vst [vmem:[%s185_s19 + $0x8] sm:$0xff] %v357_v63 }
 0x175   : > { %564 = shalt.err (!%p561_p5)
}
 0x176   : > { %s565_s30 = scalar_lea.hbm %s814_s23, 256  ;;  %s569_s6 = scalar_lea.hbm %s864_s3, 512 }
 0x177   : > { %p566_p6 = scmp.ne.s32.totalorder %s814_s23, %s565_s30  ;;  %p570_p10 = scmp.lt.u32.totalorder %s814_s23, %s864_s3 }
 0x178   : > { %p571_p11 = scmp.lt.u32.totalorder %s569_s6, %s565_s30  ;;  %p573_p13 = scmp.lt.u32.totalorder %s565_s30, %s814_s23 }
 0x179   : > { %p567_p7 = pnand %p566_p6, %p693_p4 }
 0x17a   : > { %p572_p12 = por %p571_p11, %p570_p10 }
 0x17b   : > { %p568_p9 = pneg %p567_p7 }
 0x17c   : > { %p574_p0 = por %p573_p13, %p572_p12 }
 0x17e   : > { %p575_p1 = pnand %p574_p0, %p568_p9 }
 0x180   : > { %578 = shalt.err (!%p575_p1)
}
 0x181   : > { %495 = dma.vmem_to_hbm [thread:$0]  (%p693_p4), %s816_s10, 256, %s814_s23, %s362_s26  }
 0x182 PF: > { %p501_p2 = scmp.ge.s32.totalorder %s629_s17, 2  ;;  %s390_s9 = sand.u32 1, %s609_s12  }
 0x183   : > { %s391_s18 = scalar_lea.sflag [#allocation3], %s390_s9 }
 0x184   : > { %p498_p3 = pnand %p501_p2, %p700_p8 }
 0x186   : > { %604 = dma.done.wait (!%p498_p3), %s391_s18, 256  }
 0x187   : > { %606 = vsyncadd (!%p498_p3), %s391_s18, 4294967040  ;;  %s16_s17 = sadd.s32 1, %s629_s17   ;;  %s867_s12 = smov %s613_s13 }
 0x188   : > { %p13_p5 = scmp.ge.s32.totalorder %s16_s17, 4   ;;  %s868_s13 = smov %s617_s14 }
 0x189   : > { %s869_s14 = smov %s706_s25  ;;  %s870_s15 = smov %s625_s16 }
 0x18a   : > { %s871_s16 = smov %s873_s20  ;;  %15 = sbr.rel (!%p13_p5) target bundleno = 4 (0x4), region = 67 }
 0x191   :  { %396 = vsyncpa [#allocation3], 1 }
 0x192   :  { %398 = vsyncpa [#allocation3 + $0x1], 1 }

</bundles_post_ra>
